<compile_context>
chip_gen: v6e
topology: v6e:2x2x1
jax: 0.10.0
libtpu: 0.0.40
codegen_flags: <defaults>
</compile_context>

<pallas_src>
import jax
import jax.numpy as jnp
from jax.experimental import pallas as pl
from jax.experimental.pallas import tpu as pltpu

# ---- model config (model_cfg equivalent, embedder != 'OneHot') ----
IN_CHANNELS  = 8      # in_channels
EMBED_DIM    = 32     # model_cfg.embed_dim
NUM_CHANNELS = 64     # model_cfg.num_channels
KERNEL_SIZE  = 3      # model_cfg.kernel_size
NUM_CLASSES  = 7
SEQ_LEN      = 16
BATCH        = 2
L_OUT        = SEQ_LEN - KERNEL_SIZE + 1
LANES        = 128    # lane width of the packed parameter slab / output slab


def _round8(n):
    return ((n + 7) // 8) * 8


# ---- static row offsets inside the packed parameter slab (each section 8-row aligned) ----
OFF_WE = 0                                            # (C_in, E)
OFF_BE = OFF_WE + _round8(IN_CHANNELS)                # (1, E)
OFF_WC = OFF_BE + _round8(1)                          # K blocks of (E, C_out)
OFF_BC = OFF_WC + KERNEL_SIZE * _round8(EMBED_DIM)    # (1, C_out)
OFF_WL = OFF_BC + _round8(1)                          # (C_out, 128)  zero-padded lanes
OFF_BL = OFF_WL + _round8(NUM_CHANNELS)               # (1, 128)      zero-padded lanes
SLAB_ROWS = OFF_BL + _round8(1)


def cnn_kernel(x_ref, p_ref, o_ref):
    # x_ref: (B*L, C_in) f32     p_ref: (SLAB_ROWS, 128) f32     o_ref: (B, 128) f32
    BL, C_in = x_ref.shape
    B = o_ref.shape[0]
    L = BL // B
    E, C_out, K = EMBED_DIM, NUM_CHANNELS, KERNEL_SIZE
    L_out = L - K + 1

    # ---- static slices of the packed parameter slab ----
    we = p_ref[OFF_WE:OFF_WE + C_in, :E].astype(jnp.bfloat16)     # (C_in, E)
    be = p_ref[OFF_BE:OFF_BE + 1, :E]                             # (1, E)   f32
    bc = p_ref[OFF_BC:OFF_BC + 1, :C_out]                         # (1, C_out) f32
    wl = p_ref[OFF_WL:OFF_WL + C_out, :].astype(jnp.bfloat16)     # (C_out, 128), lanes >=7 are 0
    bl = p_ref[OFF_BL:OFF_BL + 1, :]                              # (1, 128) f32, lanes >=7 are 0

    # ---- embedding Linear: one batch-folded GEMM (bf16 MXU, f32 accumulate) ----
    e = jnp.dot(x_ref[...].astype(jnp.bfloat16), we,
                preferred_element_type=jnp.float32) + be          # (BL, E) f32

    # ---- Conv1d(stride=1, no padding): K accumulated GEMMs over rolled taps ----
    acc = jnp.zeros((BL, C_out), jnp.float32)
    for k in range(K):
        tap = e if k == 0 else pltpu.roll(e, shift=BL - k, axis=0)
        wck = p_ref[OFF_WC + k * E:OFF_WC + (k + 1) * E, :C_out].astype(jnp.bfloat16)
        acc = acc + jnp.dot(tap.astype(jnp.bfloat16), wck,
                            preferred_element_type=jnp.float32)
    relu = jnp.maximum(acc + bc, 0.0)                             # (BL, C_out) f32

    # Rows whose conv window wrapped past a sequence boundary are garbage: zero them.
    # Exact because ReLU output >= 0, so zeros never change the per-sequence max.
    row = jax.lax.broadcasted_iota(jnp.int32, (BL, C_out), 0)
    relu = jnp.where((row % L) < L_out, relu, 0.0)

    # ---- AdaptiveMaxPool1d(1): global max over valid conv positions ----
    pooled = jnp.max(relu.reshape(B, L, C_out), axis=1)           # (B, C_out) f32

    # Dropout is identity in eval mode; classifier GEMM -> lane-dense (B, 128) store.
    logits = jnp.dot(pooled.astype(jnp.bfloat16), wl,
                     preferred_element_type=jnp.float32) + bl
    o_ref[...] = logits.astype(o_ref.dtype)


def pack_params(params):
    """Pack the six parameter arrays into one lane-padded (SLAB_ROWS, 128) f32 slab."""
    we, be, wc, bc, wl, bl = params
    slab = jnp.zeros((SLAB_ROWS, LANES), jnp.float32)
    slab = slab.at[OFF_WE:OFF_WE + IN_CHANNELS, :EMBED_DIM].set(we)
    slab = slab.at[OFF_BE:OFF_BE + 1, :EMBED_DIM].set(be)
    for k in range(KERNEL_SIZE):
        slab = slab.at[OFF_WC + k * EMBED_DIM:OFF_WC + (k + 1) * EMBED_DIM,
                       :NUM_CHANNELS].set(wc[k])
    slab = slab.at[OFF_BC:OFF_BC + 1, :NUM_CHANNELS].set(bc)
    slab = slab.at[OFF_WL:OFF_WL + NUM_CHANNELS, :NUM_CLASSES].set(wl)
    slab = slab.at[OFF_BL:OFF_BL + 1, :NUM_CLASSES].set(bl)
    return slab


def cnn_forward(x, params):
    B, L, C_in = x.shape
    assert KERNEL_SIZE <= L, "wrap-mask trick requires kernel_size <= seq_len (L_out >= 1)"
    x2d = x.reshape(B * L, C_in)        # flatten wrapper-side: no in-kernel value reshape for x
    slab = pack_params(params)
    vmem = lambda: pl.BlockSpec(memory_space=pltpu.MemorySpace.VMEM)
    # Gridless: one invocation, 2 operands (x + packed params), lane-dense output slab.
    out_pad = pl.pallas_call(
        cnn_kernel,
        out_shape=jax.ShapeDtypeStruct((B, LANES), jnp.float32),
        in_specs=[vmem(), vmem()],
        out_specs=vmem(),
    )(x2d, slab)
    return out_pad[:, :NUM_CLASSES]


def init_params(key):
    ks = jax.random.split(key, 6)
    # embed: Linear(in_channels -> embed_dim); stored already transposed (C_in, E)
    we = jax.random.normal(ks[0], (IN_CHANNELS, EMBED_DIM), jnp.float32) * 0.1
    be = jax.random.normal(ks[1], (1, EMBED_DIM), jnp.float32) * 0.1
    # conv: Conv1d(embed_dim -> num_channels, kernel_size); stored as (K, E, C_out)
    wc = jax.random.normal(ks[2], (KERNEL_SIZE, EMBED_DIM, NUM_CHANNELS), jnp.float32) * 0.1
    bc = jax.random.normal(ks[3], (1, NUM_CHANNELS), jnp.float32) * 0.1
    # classifier: Linear(num_channels -> 7); stored transposed (C_out, 7)
    wl = jax.random.normal(ks[4], (NUM_CHANNELS, NUM_CLASSES), jnp.float32) * 0.1
    bl = jax.random.normal(ks[5], (1, NUM_CLASSES), jnp.float32) * 0.1
    return we, be, wc, bc, wl, bl


def cnn_reference(x, params):
    """Pure-JAX f32 reference mirroring the PyTorch forward (eval mode)."""
    we, be, wc, bc, wl, bl = params
    e = x @ we + be                                            # (B, L, E)
    conv = jnp.zeros((x.shape[0], L_OUT, NUM_CHANNELS), jnp.float32)
    for k in range(KERNEL_SIZE):
        conv = conv + jnp.einsum("ble,ec->blc", e[:, k:k + L_OUT, :], wc[k])
    conv = jnp.maximum(conv + bc, 0.0)
    pooled = jnp.max(conv, axis=1)                             # (B, C_out)
    return pooled @ wl + bl


if __name__ == "__main__":
    key = jax.random.PRNGKey(0)
    kx, kp = jax.random.split(key)
    x = jax.random.normal(kx, (BATCH, SEQ_LEN, IN_CHANNELS), jnp.float32)
    params = init_params(kp)

    out = cnn_forward(x, params)
    out = jax.block_until_ready(out)

    ref = cnn_reference(x, params)
    assert out.shape == (BATCH, NUM_CLASSES)
    # bf16 MXU inputs with f32 accumulation: tolerance loosened per review.
    assert jnp.allclose(out, ref, atol=3e-2, rtol=3e-2), (out, ref)
    print("KERNEL_OK")
</pallas_src>

<mosaic_0001>
module attributes {stable_mosaic.version = 11 : i64} {
  func.func @cnn_kernel(%arg0: memref<32x8xf32, #tpu.memory_space<vmem>>, %arg1: memref<192x128xf32, #tpu.memory_space<vmem>>, %arg2: memref<2x128xf32, #tpu.memory_space<vmem>>) attributes {dimension_semantics = [], scalar_prefetch = 0 : i64, scratch_operands = 0 : i64, tpu.core_type = #tpu.core_type<tc>} {
    %c0 = arith.constant 0 : index
    %c0_0 = arith.constant 0 : index
    %0 = vector.load %arg1[%c0, %c0_0] : memref<192x128xf32, #tpu.memory_space<vmem>>, vector<8x32xf32>
    %1 = arith.truncf %0 : vector<8x32xf32> to vector<8x32xbf16>
    %c8 = arith.constant 8 : index
    %c0_1 = arith.constant 0 : index
    %2 = vector.load %arg1[%c8, %c0_1] : memref<192x128xf32, #tpu.memory_space<vmem>>, vector<1x32xf32>
    %c112 = arith.constant 112 : index
    %c0_2 = arith.constant 0 : index
    %3 = vector.load %arg1[%c112, %c0_2] : memref<192x128xf32, #tpu.memory_space<vmem>>, vector<1x64xf32>
    %c120 = arith.constant 120 : index
    %c0_3 = arith.constant 0 : index
    %4 = vector.load %arg1[%c120, %c0_3] : memref<192x128xf32, #tpu.memory_space<vmem>>, vector<64x128xf32>
    %5 = arith.truncf %4 : vector<64x128xf32> to vector<64x128xbf16>
    %c184 = arith.constant 184 : index
    %c0_4 = arith.constant 0 : index
    %6 = vector.load %arg1[%c184, %c0_4] : memref<192x128xf32, #tpu.memory_space<vmem>>, vector<1x128xf32>
    %c0_5 = arith.constant 0 : index
    %c0_6 = arith.constant 0 : index
    %7 = vector.load %arg0[%c0_5, %c0_6] : memref<32x8xf32, #tpu.memory_space<vmem>>, vector<32x8xf32>
    %8 = arith.truncf %7 : vector<32x8xf32> to vector<32x8xbf16>
    %cst = arith.constant dense<0.000000e+00> : vector<32x32xf32>
    %9 = tpu.matmul %8, %1, %cst {dimension_numbers = #tpu.dot_dimension_numbers<[1], [0], [0], [1], [0, 0, 1, 1], [], []>} : vector<32x8xbf16>, vector<8x32xbf16>, vector<32x32xf32> -> vector<32x32xf32>
    %10 = vector.broadcast %2 : vector<1x32xf32> to vector<32x32xf32>
    %11 = arith.addf %9, %10 : vector<32x32xf32>
    %cst_7 = arith.constant 0.000000e+00 : f32
    %12 = vector.broadcast %cst_7 : f32 to vector<32x64xf32>
    %c16 = arith.constant 16 : index
    %c0_8 = arith.constant 0 : index
    %13 = vector.load %arg1[%c16, %c0_8] : memref<192x128xf32, #tpu.memory_space<vmem>>, vector<32x64xf32>
    %14 = arith.truncf %13 : vector<32x64xf32> to vector<32x64xbf16>
    %15 = arith.truncf %11 : vector<32x32xf32> to vector<32x32xbf16>
    %cst_9 = arith.constant dense<0.000000e+00> : vector<32x64xf32>
    %16 = tpu.matmul %15, %14, %cst_9 {dimension_numbers = #tpu.dot_dimension_numbers<[1], [0], [0], [1], [0, 0, 1, 1], [], []>} : vector<32x32xbf16>, vector<32x64xbf16>, vector<32x64xf32> -> vector<32x64xf32>
    %17 = arith.addf %12, %16 : vector<32x64xf32>
    %c31_i32 = arith.constant 31 : i32
    %18 = tpu.dynamic_rotate %11 by %c31_i32 dim 0 : vector<32x32xf32>, i32 -> vector<32x32xf32>
    %c48 = arith.constant 48 : index
    %c0_10 = arith.constant 0 : index
    %19 = vector.load %arg1[%c48, %c0_10] : memref<192x128xf32, #tpu.memory_space<vmem>>, vector<32x64xf32>
    %20 = arith.truncf %19 : vector<32x64xf32> to vector<32x64xbf16>
    %21 = arith.truncf %18 : vector<32x32xf32> to vector<32x32xbf16>
    %cst_11 = arith.constant dense<0.000000e+00> : vector<32x64xf32>
    %22 = tpu.matmul %21, %20, %cst_11 {dimension_numbers = #tpu.dot_dimension_numbers<[1], [0], [0], [1], [0, 0, 1, 1], [], []>} : vector<32x32xbf16>, vector<32x64xbf16>, vector<32x64xf32> -> vector<32x64xf32>
    %23 = arith.addf %17, %22 : vector<32x64xf32>
    %c30_i32 = arith.constant 30 : i32
    %24 = tpu.dynamic_rotate %11 by %c30_i32 dim 0 : vector<32x32xf32>, i32 -> vector<32x32xf32>
    %c80 = arith.constant 80 : index
    %c0_12 = arith.constant 0 : index
    %25 = vector.load %arg1[%c80, %c0_12] : memref<192x128xf32, #tpu.memory_space<vmem>>, vector<32x64xf32>
    %26 = arith.truncf %25 : vector<32x64xf32> to vector<32x64xbf16>
    %27 = arith.truncf %24 : vector<32x32xf32> to vector<32x32xbf16>
    %cst_13 = arith.constant dense<0.000000e+00> : vector<32x64xf32>
    %28 = tpu.matmul %27, %26, %cst_13 {dimension_numbers = #tpu.dot_dimension_numbers<[1], [0], [0], [1], [0, 0, 1, 1], [], []>} : vector<32x32xbf16>, vector<32x64xbf16>, vector<32x64xf32> -> vector<32x64xf32>
    %29 = arith.addf %23, %28 : vector<32x64xf32>
    %30 = vector.broadcast %3 : vector<1x64xf32> to vector<32x64xf32>
    %31 = arith.addf %29, %30 : vector<32x64xf32>
    %cst_14 = arith.constant 0.000000e+00 : f32
    %32 = vector.broadcast %cst_14 : f32 to vector<32x64xf32>
    %33 = arith.maximumf %31, %32 : vector<32x64xf32>
    %34 = tpu.iota {dimensions = array<i32: 0>} : vector<32x64xi32>
    %c16_i32 = arith.constant 16 : i32
    %c0_i32 = arith.constant 0 : i32
    %35 = arith.cmpi eq, %c16_i32, %c0_i32 : i32
    %c1_i32 = arith.constant 1 : i32
    %36 = arith.select %35, %c1_i32, %c16_i32 : i32
    %37 = vector.broadcast %36 : i32 to vector<32x64xi32>
    %38 = arith.remsi %34, %37 : vector<32x64xi32>
    %c0_i32_15 = arith.constant 0 : i32
    %39 = vector.broadcast %c0_i32_15 : i32 to vector<32x64xi32>
    %40 = arith.cmpi ne, %38, %39 : vector<32x64xi32>
    %c0_i32_16 = arith.constant 0 : i32
    %41 = vector.broadcast %c0_i32_16 : i32 to vector<32x64xi32>
    %42 = arith.cmpi slt, %38, %41 : vector<32x64xi32>
    %c0_i32_17 = arith.constant 0 : i32
    %43 = arith.cmpi slt, %36, %c0_i32_17 : i32
    %44 = vector.broadcast %43 : i1 to vector<32x64xi1>
    %45 = vector.broadcast %44 : vector<32x64xi1> to vector<32x64xi1>
    %46 = arith.xori %42, %45 : vector<32x64xi1>
    %47 = arith.andi %46, %40 : vector<32x64xi1>
    %48 = vector.broadcast %36 : i32 to vector<32x64xi32>
    %49 = arith.addi %38, %48 : vector<32x64xi32>
    %50 = arith.select %47, %49, %38 : vector<32x64xi1>, vector<32x64xi32>
    %c14_i32 = arith.constant 14 : i32
    %51 = vector.broadcast %c14_i32 : i32 to vector<32x64xi32>
    %52 = arith.cmpi slt, %50, %51 : vector<32x64xi32>
    %cst_18 = arith.constant 0.000000e+00 : f32
    %53 = vector.broadcast %cst_18 : f32 to vector<32x64xf32>
    %54 = arith.select %52, %33, %53 : vector<32x64xi1>, vector<32x64xf32>
    %55 = vector.shape_cast %54 : vector<32x64xf32> to vector<2x16x64xf32>
    %cst_19 = arith.constant dense<0xFF800000> : vector<2x64xf32>
    %56 = vector.multi_reduction <maximumf>, %55, %cst_19 [1] : vector<2x16x64xf32> to vector<2x64xf32>
    %57 = arith.truncf %56 : vector<2x64xf32> to vector<2x64xbf16>
    %cst_20 = arith.constant dense<0.000000e+00> : vector<2x128xf32>
    %58 = tpu.matmul %57, %5, %cst_20 {dimension_numbers = #tpu.dot_dimension_numbers<[1], [0], [0], [1], [0, 0, 1, 1], [], []>} : vector<2x64xbf16>, vector<64x128xbf16>, vector<2x128xf32> -> vector<2x128xf32>
    %59 = vector.broadcast %6 : vector<1x128xf32> to vector<2x128xf32>
    %60 = arith.addf %58, %59 : vector<2x128xf32>
    %c0_21 = arith.constant 0 : index
    %c0_22 = arith.constant 0 : index
    %61 = vector.load %arg2[%c0_21, %c0_22] : memref<2x128xf32, #tpu.memory_space<vmem>>, vector<2x128xf32>
    tpu.vector_store %arg2[%c0_21, %c0_22], %60 {strides = array<i32>} : memref<2x128xf32, #tpu.memory_space<vmem>>, vector<2x128xf32>,
    return
  }
}

</mosaic_0001>

<bundles_post_ra>
// kernel: tpu_custom_call.1
= control target key start
LH: loop header
LB: loop body
LE: loop exit
PB: predicated region body
PF: predicated region fallthrough
CT: control target
= control target key end

     0   :  { %7 = vsyncpa [#allocation3], 0  ;;  %s687_s0 = inlined_call_operand.vmem [shape: f32[32,8], index: 0, kind: input, shape index: {}]   ;;  %s688_s1 = inlined_call_operand.hbm [shape: f32[192,128], index: 1, kind: input, shape index: {}]   ;;  %s689_s2 = inlined_call_operand.hbm [shape: f32[2,128], index: 2, kind: output, shape index: {}]  }
   0x1   :  { %8 = vsyncpa [#allocation4], 0  ;;  %s615_s9 = smov [#allocation2]  }
   0x2   :  { %s16_s10 = sshll.u32 %s615_s9, 4  ;;  %s17_s10 = int_to_ptr.vmem [resolvable:$true] %s16_s10 }
   0x3   :  { %s579_s11 = scalar_lea.vmem %s17_s10, 3072  ;;  %p584_p1 = scmp.lt.s32.totalorder %s17_s10, %s17_s10 }
   0x4   :  { %p580_p0 = scmp.ne.s32.totalorder %s17_s10, %s579_s11  ;;  %p585_p2 = scmp.lt.s32.totalorder %s579_s11, %s579_s11 }
   0x6   :  { %p586_p3 = por %p585_p2, %p584_p1 }
   0x8   :  { %p587_p4 = pnand %p586_p3, %p580_p0 }
   0xa   :  { %590 = shalt.err (!%p587_p4)
}
   0xb   :  { %s616_s12 = smov 128   ;;  %s617_s13 = smov 8  }
   0xc   :  { %22 = dma.hbm_to_vmem [thread:$0]  %s688_s1, 3072, %s17_s10, [#allocation3], %s616_s12, %s616_s12, %s617_s13  }
   0xd   :  { %611 = dma.done.wait [#allocation3], 3072  }
   0xe   :  { %612 = vsyncadd [#allocation3], 4294964224  ;;  %v27_v0 = vld [vmem:[#allocation2] sm:$0xff]  ;;  %vm61_vm0 = vcmask 1043456   ;;  %v45_v2 = vld [vmem:[%s687_s0 + $0x8] sm:$0xff]  ;;  %vm54_vm1 = vcmask 64512   ;;  %v126_v25 = vlaneseq }
   0xf   :  { %v44_v1 = vld [vmem:[%s687_s0] sm:$0xff]  ;;  %v28_v3 = vpack.c.bf16 %v27_v0, %v27_v0  ;;  %v46_v5 = vld [vmem:[%s687_s0 + $0x10] sm:$0xff]  ;;  %v47_v6 = vld [vmem:[%s687_s0 + $0x18] sm:$0xff]  ;;  %vm141_vm4 = vcmask 261120   ;;  %v618_v63 = vmov 0.0   ;;  %vm619_vm5 = vmmov 0  }
  0x10   :  { %v48_v4 = vpack.c.bf16 %v45_v2, %v44_v1  ;;  %v49_v8 = vpack.c.bf16 %v47_v6, %v46_v5  ;;  %v116_v9 = vld [vmem:[#allocation2 + $0x20] sm:$0xff]  ;;  %v117_v10 = vld [vmem:[#allocation2 + $0x28] sm:$0xff]  ;;  %v114_v15 = vld [vmem:[#allocation2 + $0x10] sm:$0xff]  ;;  %v651_v29 = vshrl.u32 %v126_v25, 7  ;;  %vm399_vm7 = vcmask 523264   ;;  %s620_s0 = smov [#allocation5]  }
  0x11   :  { %564 = vmatprep.subr.msk.bf16.mxu1 %vm61_vm0, %v28_v3  ;;  %v63_v7 = vsel %vm61_vm0, %v28_v3, 0  ;;  %v119_v11 = vpack.c.bf16 %v117_v10, %v116_v9  ;;  %v135_v12 = vld [vmem:[#allocation2 + $0x40] sm:$0xff]  ;;  %v136_v13 = vld [vmem:[#allocation2 + $0x48] sm:$0xff]  ;;  %v115_v16 = vld [vmem:[#allocation2 + $0x18] sm:$0xff]  ;;  %vm428_vm9 = vcmask 1041409   ;;  %s481_s23 = sshll.u32 %s620_s0, 4  ;;  %s482_s23 = int_to_ptr.vmem [resolvable:$true] %s481_s23 }
  0x12   :  { %524 = vmatprep.mubr.msk.bf16.mxu1 %vm54_vm1, %v48_v4  ;;  %523 = vmatpush3.bf16.msra.mxu1 %v63_v7  ;;  %v138_v14 = vpack.c.bf16 %v136_v13, %v135_v12  ;;  %v118_v17 = vpack.c.bf16 %v115_v16, %v114_v15  ;;  %v133_v18 = vld [vmem:[#allocation2 + $0x30] sm:$0xff]  ;;  %v134_v19 = vld [vmem:[#allocation2 + $0x38] sm:$0xff]  ;;  %v263_v21 = vld [vmem:[#allocation2 + $0x60] sm:$0xff]  ;;  %vm128_vm2 = vcmp.lt.s32.totalorder %v651_v29, 7  ;;  %vm256_vm3 = vcmp.lt.s32.totalorder %v651_v29, 6  ;;  %s591_s24 = scalar_lea.vmem %s482_s23, 32  ;;  %p596_p6 = scmp.lt.s32.totalorder %s482_s23, %s482_s23 }
  0x13   :  { %536 = vmatprep.subr.bf16.mxu0 %v119_v11  ;;  %v137_v20 = vpack.c.bf16 %v134_v19, %v133_v18  ;;  %v264_v22 = vld [vmem:[#allocation2 + $0x68] sm:$0xff]  ;;  %v261_v46 = vld [vmem:[#allocation2 + $0x50] sm:$0xff]  ;;  %v262_v47 = vld [vmem:[#allocation2 + $0x58] sm:$0xff]  ;;  %v342_v18 = vadd.s32 24, %v651_v29  ;;  %p592_p5 = scmp.ne.s32.totalorder %s482_s23, %s591_s24  ;;  %p597_p7 = scmp.lt.s32.totalorder %s591_s24, %s591_s24 }
  0x14   :  { %537 = vmatpush3.bf16.msra.mxu0 %v119_v11  ;;  %528 = vmatprep.subr.bf16.mxu1 %v138_v14  ;;  %v266_v23 = vpack.c.bf16 %v264_v22, %v263_v21  ;;  %v490_v26 = vld [vmem:[#allocation2 + $0x8] ss:$0 sm:$0xff]  ;;  %v265_v54 = vpack.c.bf16 %v262_v47, %v261_v46  ;;  %v38_v61 = vld [vmem:[#allocation2 + $0xb0] sm:$0xff]  ;;  %v35_v0 = vld [vmem:[#allocation2 + $0x98] sm:$0xff] }
  0x15   :  { %525 = vmatmul.mubr.msk.bf16.vlgmr.msra.gmra.mxu1 %vm54_vm1, %v49_v8  ;;  %538 = vmatprep.subr.bf16.mxu0 %v118_v17  ;;  %v37_v60 = vld [vmem:[#allocation2 + $0xa8] sm:$0xff]  ;;  %v36_v1 = vld [vmem:[#allocation2 + $0xa0] sm:$0xff]  ;;  %v34_v4 = vld [vmem:[#allocation2 + $0x90] sm:$0xff]  ;;  %p598_p8 = por %p597_p7, %p596_p6 }
  0x16   :  { %529 = vmatpush3.bf16.msra.mxu1 %v138_v14  ;;  %v42_v62 = vpack.c.bf16 %v38_v61, %v37_v60  ;;  %v41_v2 = vpack.c.bf16 %v36_v1, %v35_v0  ;;  %v33_v3 = vld [vmem:[#allocation2 + $0x88] sm:$0xff]  ;;  %v31_v6 = vld [vmem:[#allocation2 + $0x78] sm:$0xff]  ;;  %v32_v7 = vld [vmem:[#allocation2 + $0x80] sm:$0xff] }
  0x17   :  { %530 = vmatprep.subr.bf16.mxu1 %v137_v20  ;;  %v40_v5 = vpack.c.bf16 %v34_v4, %v33_v3  ;;  %v39_v8 = vpack.c.bf16 %v32_v7, %v31_v6  ;;  %v500_v4 = vld [vmem:[#allocation2 + $0xb8] ss:$0 sm:$0xff]  ;;  %p599_p9 = pnand %p598_p8, %p592_p5 }
  0x18   :  { %539 = vmatpush3.bf16.msra.mxu0 %v118_v17 }
  0x19   :  { %552 = vmatprep.subr.bf16.mxu0 %v618_v63 }
  0x1a   :  { %531 = vmatpush3.bf16.msra.mxu1 %v137_v20  ;;  %v499_v20 = vld [vmem:[#allocation2 + $0x70] ss:$0 sm:$0xff] }
  0x1b   :  { %544 = vmatprep.subr.bf16.mxu1 %v266_v23 }
  0xd5   :  { %v526_v24 = vpop.f32.mrf.mxu1 }
  0xd6   :  { %v108_v30 = vadd.f32 %v526_v24, %v490_v26 }
  0xd7   :  { %v99_v27 = vpop.f32.mrf.mxu1 }
  0xd8   :  { %v100_v31 = vadd.f32 %v490_v26, %v99_v27  ;;  %v124_v36 = vrot.slane %v108_v30, 1  ;;  %v254_v38 = vrot.slane %v108_v30, 2 }
  0xd9   :  { %v527_v28 = vpop.f32.mrf.mxu1 }
  0xda   :  { %v111_v32 = vadd.f32 %v527_v28, %v490_v26  ;;  %v122_v37 = vrot.slane %v100_v31, 1  ;;  %v252_v39 = vrot.slane %v100_v31, 2 }
  0xdb   :  { %v102_v33 = vpop.f32.mrf.mxu1 }
  0xdc   :  { %v125_v34 = vrot.slane %v111_v32, 1  ;;  %v103_v35 = vadd.f32 %v490_v26, %v102_v33  ;;  %v121_v42 = vpack.c.bf16 %v111_v32, %v108_v30  ;;  %v255_v55 = vrot.slane %v111_v32, 2 }
  0xdd   :  { %v368_v30 = vand.u32 15, %v342_v18 }
  0xde   :  { %v123_v40 = vrot.slane %v103_v35, 1  ;;  %v253_v41 = vrot.slane %v103_v35, 2  ;;  %v129_v43 = vsel %vm128_vm2, %v124_v36, %v125_v34  ;;  %v132_v44 = vsel %vm128_vm2, %v125_v34, %v122_v37 }
  0xdf   :  { %v120_v45 = vpack.c.bf16 %v103_v35, %v100_v31  ;;  %v140_v53 = vpack.c.bf16 %v132_v44, %v129_v43  ;;  %v257_v57 = vsel %vm256_vm3, %v254_v38, %v255_v55  ;;  %v260_v58 = vsel %vm256_vm3, %v255_v55, %v252_v39 }
  0xe0   :  { %v130_v48 = vsel %vm128_vm2, %v123_v40, %v124_v36  ;;  %v131_v49 = vsel %vm128_vm2, %v122_v37, %v123_v40  ;;  %v258_v50 = vsel %vm256_vm3, %v253_v41, %v254_v38  ;;  %v259_v51 = vsel %vm256_vm3, %v252_v39, %v253_v41 }
  0xe1   :  { %540 = vmatprep.mubr.msk.bf16.mxu0 %vm141_vm4, %v120_v45  ;;  %v139_v52 = vpack.c.bf16 %v130_v48, %v131_v49  ;;  %v267_v56 = vpack.c.bf16 %v258_v50, %v259_v51  ;;  %v268_v59 = vpack.c.bf16 %v260_v58, %v257_v57  ;;  %vm394_vm6 = vcmp.lt.s32.totalorder %v368_v30, 14 }
  0xe2   :  { %541 = vmatmul.mubr.msk.bf16.vlgmr.msra.gmra.mxu0 %vm141_vm4, %v121_v42 }
  0xe3   :  { %532 = vmatprep.mubr.msk.bf16.mxu1 %vm141_vm4, %v139_v52  ;;  %553 = vmatpush3.bf16.msra.mxu0 %v42_v62 }
  0xe4   :  { %533 = vmatmul.mubr.msk.bf16.vlgmr.msra.gmra.mxu1 %vm141_vm4, %v140_v53  ;;  %554 = vmatprep.subr.bf16.mxu0 %v618_v63 }
  0xe5   :  { %545 = vmatpush3.bf16.msra.mxu1 %v266_v23  ;;  %548 = vmatprep.mubr.msk.bf16.mxu1 %vm141_vm4, %v267_v56  ;;  %v340_v23 = vadd.s32 8, %v651_v29 }
  0xe6   :  { %546 = vmatprep.subr.bf16.mxu1 %v265_v54  ;;  %560 = vmatprep.mubr.msk.bf16.mxu0 %vm619_vm5, %v618_v63 }
  0xe7   :  { %555 = vmatpush3.bf16.msra.mxu0 %v41_v2  ;;  %v354_v35 = vand.u32 15, %v340_v23 }
  0xe8   :  { %556 = vmatprep.subr.bf16.mxu0 %v618_v63 }
  0xe9   :  { %547 = vmatpush3.bf16.msra.mxu1 %v265_v54  ;;  %vm392_vm8 = vcmp.lt.s32.totalorder %v354_v35, 14 }
  0xeb   :  { %557 = vmatpush3.bf16.msra.mxu0 %v40_v5 }
  0xec   :  { %549 = vmatmul.mubr.msk.bf16.vlgmr.msra.gmra.mxu1 %vm141_vm4, %v268_v59  ;;  %558 = vmatprep.subr.bf16.mxu0 %v618_v63 }
  0xef   :  { %559 = vmatpush3.bf16.msra.mxu0 %v39_v8 }
 0x1a2   :  { %v542_v9 = vpop.f32.mrf.mxu0 }
 0x1a4   :  { %v534_v10 = vpop.f32.mrf.mxu1  ;;  %v237_v12 = vpop.f32.mrf.mxu0 }
 0x1a5   :  { %v246_v15 = vadd.f32 %v542_v9, %v534_v10 }
 0x1a6   :  { %v182_v11 = vpop.f32.mrf.mxu1  ;;  %v543_v16 = vpop.f32.mrf.mxu0 }
 0x1a7   :  { %v238_v19 = vadd.f32 %v237_v12, %v182_v11 }
 0x1a8   :  { %v535_v13 = vpop.f32.mrf.mxu1  ;;  %v240_v26 = vpop.f32.mrf.mxu0 }
 0x1a9   :  { %v249_v24 = vadd.f32 %v543_v16, %v535_v13 }
 0x1aa   :  { %v185_v14 = vpop.f32.mrf.mxu1 }
 0x1ab   :  { %v241_v31 = vadd.f32 %v240_v26, %v185_v14 }
 0x1ac   :  { %v550_v17 = vpop.f32.mrf.mxu1 }
 0x1ad   :  { %v326_v21 = vadd.f32 %v550_v17, %v246_v15 }
 0x1ae   :  { %v309_v22 = vpop.f32.mrf.mxu1 }
 0x1af   :  { %v324_v25 = vadd.f32 %v309_v22, %v238_v19  ;;  %v334_v27 = vadd.f32 %v499_v20, %v326_v21 }
 0x1b0   :  { %v551_v28 = vpop.f32.mrf.mxu1 }
 0x1b1   :  { %v327_v32 = vadd.f32 %v551_v28, %v249_v24  ;;  %v332_v33 = vadd.f32 %v499_v20, %v324_v25  ;;  %v338_v38 = vmax.f32 %v334_v27, 0.0 }
 0x1b2   :  { %v312_v34 = vpop.f32.mrf.mxu1 }
 0x1b3   :  { %v335_v36 = vadd.f32 %v499_v20, %v327_v32  ;;  %v325_v37 = vadd.f32 %v312_v34, %v241_v31  ;;  %v336_v41 = vmax.f32 %v332_v33, 0.0  ;;  %v409_v43 = vsel %vm399_vm7, %v338_v38, -inf }
 0x1b5   :  { %v339_v39 = vmax.f32 %v335_v36, 0.0  ;;  %v333_v40 = vadd.f32 %v499_v20, %v325_v37  ;;  %v400_v47 = vsel %vm399_vm7, %v336_v41, -inf }
 0x1b7   :  { %v398_v29 = vsel %vm394_vm6, %v339_v39, 0.0  ;;  %v337_v42 = vmax.f32 %v333_v40, 0.0 }
 0x1b8   :  { %v410_v44 = vsel %vm399_vm7, %v398_v29, -inf }
 0x1b9   :  { %v411_v45 = vmax.f32 %v409_v43, %v410_v44  ;;  %v396_v46 = vsel %vm392_vm8, %v337_v42, 0.0 }
 0x1ba   :  { %v401_v48 = vsel %vm399_vm7, %v396_v46, -inf }
 0x1bb   :  { %v412_v49 = vrot.slane %v411_v45, 4  ;;  %v402_v50 = vmax.f32 %v400_v47, %v401_v48 }
 0x1bd   :  { %v413_v51 = vmax.f32 %v411_v45, %v412_v49  ;;  %v403_v52 = vrot.slane %v402_v50, 4 }
 0x1bf   :  { %v414_v53 = vrot.slane %v413_v51, 2  ;;  %v404_v54 = vmax.f32 %v402_v50, %v403_v52 }
 0x1c1   :  { %v415_v55 = vmax.f32 %v413_v51, %v414_v53  ;;  %v405_v56 = vrot.slane %v404_v54, 2 }
 0x1c3   :  { %v416_v57 = vrot.slane %v415_v55, 1  ;;  %v406_v58 = vmax.f32 %v404_v54, %v405_v56 }
 0x1c5   :  { %v417_v59 = vmax.f32 %v415_v55, %v416_v57  ;;  %v407_v60 = vrot.slane %v406_v58, 1 }
 0x1c7   :  { %v419_v61 = vpack.c.bf16 %v417_v59, %v417_v59  ;;  %v408_v62 = vmax.f32 %v406_v58, %v407_v60 }
 0x1c9   :  { %v418_v63 = vpack.c.bf16 %v408_v62, %v408_v62  ;;  %v427_v0 = vunpack.c.l.b16 %v419_v61 }
 0x1cb   :  { %v426_v1 = vunpack.c.l.b16 %v418_v63 }
 0x1cd   :  { %v429_v2 = vsel %vm428_vm9, %v427_v0, %v426_v1 }
 0x1ce   :  { %v430_v3 = vpack.c.b16 %v429_v2, %v429_v2 }
 0x1d0   :  { %561 = vmatmul.mubr.msk.bf16.vlgmr.msra.gmra.mxu0 %vm399_vm7, %v430_v3 }
 0x290   :  { %v468_v5 = vpop.f32.mrf.mxu0 }
 0x291   :  { %v469_v6 = vadd.f32 %v500_v4, %v468_v5 }
 0x292   :  { %v562_v7 = vpop.f32.mrf.mxu0 }
 0x293   :  { %474 = vst [vmem:[#allocation5] sm:$0x3] %v469_v6 }
 0x294   :  { %v471_v8 = vpop.f32.mrf.mxu0 }
 0x295   :  { %602 = shalt.err (!%p599_p9)
}
 0x296   :  { %484 = dma.vmem_to_hbm [thread:$0]  %s482_s23, 32, %s689_s2, [#allocation4]   ;;  %v563_v9 = vpop.f32.mrf.mxu0 }
 0x297   :  { %613 = dma.done.wait [#allocation4], 32  }
 0x298   :  { %614 = vsyncadd [#allocation4], 4294967264 }
 0x299   :  { %488 = vsyncpa [#allocation3], 1 }
 0x29a   :  { %489 = vsyncpa [#allocation4], 1 }

</bundles_post_ra>
